<compile_context>
chip_gen: v7x
topology: tpu7x:2x2x1
jax: 0.10.0
libtpu: 0.0.40
codegen_flags: <defaults>
</compile_context>

<pallas_src>
import functools
import math

import jax
import jax.numpy as jnp
from jax import lax
from jax.experimental import pallas as pl
from jax.experimental.pallas import tpu as pltpu


# --------------------------------------------------------------------------- #
# helpers
# --------------------------------------------------------------------------- #

def _round_up(x, m):
    return (x + m - 1) // m * m


def _tile_and_pad(n, target, quantum=128):
    """Pick a tile for a length-`n` axis.  Returns (tile, padded_n).

    The tile is either the full axis (single block) or a multiple of `quantum`
    (TPU lane/sublane alignment).  If `n` has no suitable divisor the axis is
    padded up to a multiple of the tile instead of silently using a whole-map
    block (avoids the VMEM cliff on awkward resolutions)."""
    if n <= target:
        return n, n
    t = max((target // quantum) * quantum, quantum)
    cand = t
    while cand >= quantum:
        if n % cand == 0:
            return cand, n
        cand -= quantum
    return t, _round_up(n, t)


def _compiler_params(semantics, block_bytes, extra_bytes=0):
    """CompilerParams with an explicit scoped-VMEM limit derived from the
    actual block sizes (2x for double buffering + temporaries + margin),
    clamped so the request stays safe on every generation (v7x: 64 MiB)."""
    limit = 2 * block_bytes + extra_bytes + (4 << 20)
    limit = int(max(16 << 20, min(limit, 48 << 20)))
    return pltpu.CompilerParams(dimension_semantics=semantics,
                                vmem_limit_bytes=limit)


# --------------------------------------------------------------------------- #
# 1x1 conv, channels-first in -> channels-last out  (que_proj / val_proj)
# --------------------------------------------------------------------------- #

def _proj_cf2cl_kernel(x_ref, w_ref, b_ref, o_ref):
    # x block: (1, Cin, TQ) f32 (NCHW).  The NCHW->NHWC transpose is folded
    # into the contraction over lhs dim 0; bf16 operands, f32 accumulation.
    x = x_ref[0].astype(jnp.bfloat16)                               # (Cin, TQ)
    y = lax.dot_general(x, w_ref[...], (((0,), (0,)), ((), ())),
                        preferred_element_type=jnp.float32)         # (TQ, Cout)
    y = y + b_ref[...]                                              # (1, Cout)
    o_ref[0] = y.astype(o_ref.dtype)


def conv1x1_cf2cl(x_cf, w, b, *, tile=1024):
    """x_cf: (N, Cin, HW) f32 (NCHW flattened); w: (Cin, Cout); b: (1, Cout)
    -> (N, HW, Cout) bf16 (channels-last)."""
    N, Cin, HW = x_cf.shape
    Cout = w.shape[1]
    tq, hw_p = _tile_and_pad(HW, tile, 128)
    if hw_p != HW:
        x_cf = jnp.pad(x_cf, ((0, 0), (0, 0), (0, hw_p - HW)))
    blk = Cin * tq * 4 + Cin * Cout * 2 + Cout * 4 + tq * Cout * 2
    out = pl.pallas_call(
        _proj_cf2cl_kernel,
        out_shape=jax.ShapeDtypeStruct((N, hw_p, Cout), jnp.bfloat16),
        grid=(N, hw_p // tq),
        in_specs=[
            pl.BlockSpec((1, Cin, tq), lambda n, t: (n, 0, t)),
            pl.BlockSpec((Cin, Cout), lambda n, t: (0, 0)),
            pl.BlockSpec((1, Cout), lambda n, t: (0, 0)),
        ],
        out_specs=pl.BlockSpec((1, tq, Cout), lambda n, t: (n, t, 0)),
        compiler_params=_compiler_params(("parallel", "parallel"), blk,
                                         extra_bytes=tq * Cout * 4),
    )(x_cf, w.astype(jnp.bfloat16), b)
    return out[:, :HW, :] if hw_p != HW else out


# --------------------------------------------------------------------------- #
# 1x1 conv, channels-last in -> channels-first out  (out_proj -> NCHW)
# --------------------------------------------------------------------------- #

def _proj_cl2cf_kernel(x_ref, wt_ref, b_ref, o_ref):
    # x block: (1, TQ, Cin) bf16.  wt is the pre-transposed (Cout, Cin) weight;
    # the result is written as a lane-dense (Cout, TQ) channels-first block.
    x = x_ref[0]                                                    # (TQ, Cin)
    y = lax.dot_general(wt_ref[...], x, (((1,), (1,)), ((), ())),
                        preferred_element_type=jnp.float32)         # (Cout, TQ)
    y = y + b_ref[...]                                              # (Cout, 1)
    o_ref[0] = y.astype(o_ref.dtype)


def conv1x1_cl2cf(x_cl, w, b, *, tile=1024):
    """x_cl: (N, HW, Cin) bf16; w: (Cin, Cout); b: (1, Cout)
    -> (N, Cout, HW) f32 (NCHW layout, no wrapper transpose)."""
    N, HW, Cin = x_cl.shape
    Cout = w.shape[1]
    tq, hw_p = _tile_and_pad(HW, tile, 128)
    if hw_p != HW:
        x_cl = jnp.pad(x_cl, ((0, 0), (0, hw_p - HW), (0, 0)))
    wt = jnp.transpose(w, (1, 0)).astype(jnp.bfloat16)              # (Cout, Cin)
    bt = jnp.transpose(b, (1, 0))                                   # (Cout, 1)
    blk = tq * Cin * 2 + Cout * Cin * 2 + Cout * 4 + Cout * tq * 4
    out = pl.pallas_call(
        _proj_cl2cf_kernel,
        out_shape=jax.ShapeDtypeStruct((N, Cout, hw_p), jnp.float32),
        grid=(N, hw_p // tq),
        in_specs=[
            pl.BlockSpec((1, tq, Cin), lambda n, t: (n, t, 0)),
            pl.BlockSpec((Cout, Cin), lambda n, t: (0, 0)),
            pl.BlockSpec((Cout, 1), lambda n, t: (0, 0)),
        ],
        out_specs=pl.BlockSpec((1, Cout, tq), lambda n, t: (n, 0, t)),
        compiler_params=_compiler_params(("parallel", "parallel"), blk,
                                         extra_bytes=Cout * tq * 4),
    )(x_cl, wt, bt)
    return out[:, :, :HW] if hw_p != HW else out


# --------------------------------------------------------------------------- #
# fused conv_offset stack: 4 x (3x3 conv [+ LeakyReLU]) + tanh squash
# --------------------------------------------------------------------------- #

def _conv3x3_taps(xpad, w_ref, H, W):
    """3x3 'same' conv of a zero-padded (H+2, W+2, Cin) bf16 image as a 9-tap
    loop of (H*W, Cin) @ (Cin, Cout) bf16 MXU matmuls with f32 accumulation
    (no wide im2col concat and its VMEM copies)."""
    cin = xpad.shape[-1]
    acc = None
    for kh in range(3):
        for kw in range(3):
            tap = xpad[kh:kh + H, kw:kw + W, :].reshape(H * W, cin)
            y = jnp.dot(tap, w_ref[kh * 3 + kw],
                        preferred_element_type=jnp.float32)
            acc = y if acc is None else acc + y
    return acc                                                      # (H*W, Cout)


def _leaky(x):
    return jnp.where(x >= 0, x, 0.1 * x)


def _conv_offset_kernel(x_ref, w0_ref, b0_ref, w1_ref, b1_ref, w2_ref, b2_ref,
                        w3_ref, b3_ref, o_ref, buf_a, buf_b, *, H, W, mrm):
    """Whole conv_offset stack for one batch element; intermediate activations
    stay in VMEM scratch (bf16), removing ~6 full-tensor HBM passes vs. four
    separate conv kernels."""
    # zero the padded scratch (borders provide the 'same' zero padding;
    # interiors are overwritten below).
    buf_a[...] = jnp.zeros(buf_a.shape, buf_a.dtype)
    buf_b[...] = jnp.zeros(buf_b.shape, buf_b.dtype)

    def layer(src, w_ref, b_ref, dst):
        act = _leaky(_conv3x3_taps(src, w_ref, H, W) + b_ref[...])
        dst[1:H + 1, 1:W + 1, :] = act.reshape(H, W, act.shape[-1]).astype(dst.dtype)

    layer(x_ref[0], w0_ref, b0_ref, buf_a)
    layer(buf_a[...], w1_ref, b1_ref, buf_b)
    layer(buf_b[...], w2_ref, b2_ref, buf_a)

    out = _conv3x3_taps(buf_a[...], w3_ref, H, W) + b3_ref[...]     # (H*W, Cpad)
    if mrm:
        out = mrm * jnp.tanh(out)         # matches torch: mrm * tanh(offsets)
    o_ref[0] = out.astype(o_ref.dtype)    # lane-dense (Cpad = multiple of 128)


def conv_offset_stack(x_pad_nhwc, params, *, H, W, mrm, out_raw):
    """x_pad_nhwc: (N, H+2, W+2, 2*d_model) bf16 zero-padded stacked_feat.
    Returns (N, H*W, Cpad) f32 offsets (Cpad = out_raw rounded up to 128)."""
    # TODO(synk): for very large H*W add a row-tile grid axis with recomputed
    # halos (growing by 1 row per fused layer) so the per-step block stays
    # under v7x's 64 MiB VMEM and both TensorCores get work when N <= 2.
    N = x_pad_nhwc.shape[0]
    Cin0 = x_pad_nhwc.shape[-1]
    Cmid = params['off_w1'].shape[2]
    Cpad = _round_up(out_raw, 128)
    Hp, Wp = H + 2, W + 2

    def taps(w):                                   # (3,3,Cin,Cout)->(9,Cin,Cout)
        return w.reshape(9, w.shape[2], w.shape[3]).astype(jnp.bfloat16)

    w3p = jnp.pad(params['off_w3'], ((0, 0), (0, 0), (0, 0), (0, Cpad - out_raw)))
    b3p = jnp.pad(params['off_b3'], ((0, 0), (0, Cpad - out_raw)))

    kernel = functools.partial(_conv_offset_kernel, H=H, W=W, mrm=mrm)
    blk = (Hp * Wp * Cin0 * 2 + 9 * Cin0 * Cmid * 2 + 2 * 9 * Cmid * Cmid * 2
           + 9 * Cmid * Cpad * 2 + H * W * Cpad * 4)
    extra = 2 * Hp * Wp * Cmid * 2 + 4 * H * W * max(Cmid, Cpad) * 4
    return pl.pallas_call(
        kernel,
        out_shape=jax.ShapeDtypeStruct((N, H * W, Cpad), jnp.float32),
        grid=(N,),
        in_specs=[
            pl.BlockSpec((1, Hp, Wp, Cin0), lambda n: (n, 0, 0, 0)),
            pl.BlockSpec((9, Cin0, Cmid), lambda n: (0, 0, 0)),
            pl.BlockSpec((1, Cmid), lambda n: (0, 0)),
            pl.BlockSpec((9, Cmid, Cmid), lambda n: (0, 0, 0)),
            pl.BlockSpec((1, Cmid), lambda n: (0, 0)),
            pl.BlockSpec((9, Cmid, Cmid), lambda n: (0, 0, 0)),
            pl.BlockSpec((1, Cmid), lambda n: (0, 0)),
            pl.BlockSpec((9, Cmid, Cpad), lambda n: (0, 0, 0)),
            pl.BlockSpec((1, Cpad), lambda n: (0, 0)),
        ],
        out_specs=pl.BlockSpec((1, H * W, Cpad), lambda n: (n, 0, 0)),
        scratch_shapes=[pltpu.VMEM((Hp, Wp, Cmid), jnp.bfloat16),
                        pltpu.VMEM((Hp, Wp, Cmid), jnp.bfloat16)],
        compiler_params=_compiler_params(("parallel",), blk, extra_bytes=extra),
    )(x_pad_nhwc,
      taps(params['off_w0']), params['off_b0'],
      taps(params['off_w1']), params['off_b1'],
      taps(params['off_w2']), params['off_b2'],
      taps(w3p), b3p)


# --------------------------------------------------------------------------- #
# deformable attention core
# --------------------------------------------------------------------------- #

def _deform_attn_kernel(v_ref, q_ref, lc_ref, lr_ref, o_ref, *,
                        Lc, Lr, n_heads, n_points, ed):
    """All heads for one (batch, query-tile).

    Bilinear grid_sample(align_corners=False, padding_mode='zeros') via
    separable one-hot weights: MXU matmul (bf16 operands, f32 acc) contracting
    the longer spatial axis, then a lane-dense VPU reduction over the shorter
    axis (the reduce weights are built directly in the expanded (K, Lr*ed)
    layout, no (K, Lr, ed) lane-sparse broadcast-multiply).  Softmax over
    points with the post-softmax 1/sqrt(ed) scale, matching the reference."""
    tq = q_ref.shape[1]
    K = tq * n_points
    scale = ed ** -0.5

    v_all = v_ref[0]                                # (Lc, nh*Lr*ed) bf16
    q_all = q_ref[0].astype(jnp.float32)            # (TQ, d_model)
    lc_all = lc_ref[0]                              # (TQ, nh*np) f32 (contract axis)
    lr_all = lr_ref[0]                              # (TQ, nh*np) f32 (reduce axis)

    iota_c = lax.broadcasted_iota(jnp.int32, (1, Lc), 1)
    iota_l = lax.broadcasted_iota(jnp.int32, (1, Lr * ed), 1)   # expanded lanes

    outs = []
    for h in range(n_heads):
        v_h = v_all[:, h * Lr * ed:(h + 1) * Lr * ed]           # (Lc, Lr*ed)
        q_h = q_all[:, h * ed:(h + 1) * ed]                     # (TQ, ed)
        lc = lc_all[:, h * n_points:(h + 1) * n_points].reshape(K, 1)
        lr = lr_all[:, h * n_points:(h + 1) * n_points].reshape(K, 1)

        # grid_sample(align_corners=False): pixel = loc * size - 0.5
        ic = lc * Lc - 0.5
        ir = lr * Lr - 0.5
        c0 = jnp.floor(ic)
        r0 = jnp.floor(ir)
        wc1 = ic - c0
        wc0 = 1.0 - wc1
        wr1 = ir - r0
        wr0 = 1.0 - wr1
        c0i = c0.astype(jnp.int32)
        r0e = r0.astype(jnp.int32) * ed             # lane-expanded row index

        # one-hot bilinear weights over the contract axis (bf16 MXU lhs).
        # out-of-range corners match no column -> zero ('zeros' padding mode).
        w_c = (jnp.where(iota_c == c0i, wc0, 0.0) +
               jnp.where(iota_c == c0i + 1, wc1, 0.0)).astype(jnp.bfloat16)

        # reduce-axis weights built directly in lane-expanded (K, Lr*ed) form
        # (each weight repeated across its ed lanes via range compares).
        in0 = (iota_l >= r0e) & (iota_l < r0e + ed)
        in1 = (iota_l >= r0e + ed) & (iota_l < r0e + 2 * ed)
        w_r = jnp.where(in0, wr0, 0.0) + jnp.where(in1, wr1, 0.0)  # (K, Lr*ed)

        m1 = jnp.dot(w_c, v_h, preferred_element_type=jnp.float32)  # (K, Lr*ed)
        samp = (m1 * w_r).reshape(K, Lr, ed).sum(axis=1)            # (K, ed)
        samp = samp.reshape(tq, n_points, ed)

        # logits from the projected query; softmax over points; post-softmax
        # 1/sqrt(ed) scale (torch: softmax(...)*scale).
        # TODO(synk): pack 128//ed heads per vreg for the logits/weighted-sum
        # reductions to keep these VPU ops lane-dense at large scales.
        logits = jnp.sum(samp * q_h[:, None, :], axis=-1)           # (TQ, np)
        logits = logits - jnp.max(logits, axis=-1, keepdims=True)
        e = jnp.exp(logits)
        inv = pl.reciprocal(jnp.sum(e, axis=-1, keepdims=True), approx=True)
        attn = e * (inv * scale)
        outs.append(jnp.sum(samp * attn[:, :, None], axis=1))       # (TQ, ed)

    # lane-dense (TQ, d_model) store, channels ordered [head0 | head1 | ...]
    o_ref[0] = jnp.concatenate(outs, axis=-1).astype(o_ref.dtype)


def deform_attn(value_cl, query_cl, loc_x, loc_y, *, H, W, n_heads, n_points,
                q_tile=256):
    """value_cl/query_cl: (N, HW, d_model) bf16; loc_*: (N, HW, nh*np) f32
    -> (N, HW, d_model) bf16."""
    N, HW, d_model = value_cl.shape
    ed = d_model // n_heads

    # Contract the sampling matmul over the longer spatial axis (better MXU
    # utilisation); value is rearranged once per call so every head's
    # (Lc, Lr*ed) slab is a cheap aligned lane slice inside the kernel.
    contract_h = H >= W
    v5 = value_cl.reshape(N, H, W, n_heads, ed)
    if contract_h:
        Lc, Lr = H, W
        loc_c, loc_r = loc_y, loc_x
        v_r = v5.transpose(0, 1, 3, 2, 4).reshape(N, H, n_heads * W * ed)
    else:
        Lc, Lr = W, H
        loc_c, loc_r = loc_x, loc_y
        v_r = v5.transpose(0, 2, 3, 1, 4).reshape(N, W, n_heads * H * ed)

    tq, hw_p = _tile_and_pad(HW, q_tile, 128)
    if hw_p != HW:
        pad = ((0, 0), (0, hw_p - HW), (0, 0))
        query_cl = jnp.pad(query_cl, pad)
        loc_c = jnp.pad(loc_c, pad)
        loc_r = jnp.pad(loc_r, pad)

    kernel = functools.partial(_deform_attn_kernel, Lc=Lc, Lr=Lr,
                               n_heads=n_heads, n_points=n_points, ed=ed)
    K = tq * n_points
    blk = (Lc * n_heads * Lr * ed * 2            # bf16 value slab (resident)
           + 2 * tq * d_model * 2                # q + out blocks (bf16)
           + 2 * tq * n_heads * n_points * 4)    # location blocks (f32)
    extra = 3 * K * Lr * ed * 4 + K * Lc * 4 + 4 * K * ed * 4   # per-head temps
    out = pl.pallas_call(
        kernel,
        out_shape=jax.ShapeDtypeStruct((N, hw_p, d_model), jnp.bfloat16),
        grid=(N, hw_p // tq),
        in_specs=[
            pl.BlockSpec((1, Lc, n_heads * Lr * ed), lambda n, t: (n, 0, 0)),
            pl.BlockSpec((1, tq, d_model), lambda n, t: (n, t, 0)),
            pl.BlockSpec((1, tq, n_heads * n_points), lambda n, t: (n, t, 0)),
            pl.BlockSpec((1, tq, n_heads * n_points), lambda n, t: (n, t, 0)),
        ],
        out_specs=pl.BlockSpec((1, tq, d_model), lambda n, t: (n, t, 0)),
        compiler_params=_compiler_params(("parallel", "parallel"), blk,
                                         extra_bytes=extra),
    )(v_r, query_cl, loc_c, loc_r)
    return out[:, :HW, :] if hw_p != HW else out


# --------------------------------------------------------------------------- #
# module forward (NCHW in / NCHW out, matching the torch module)
# --------------------------------------------------------------------------- #

def forward(params, stacked_feat, reference_points, query, value,
            input_spatial_shapes, input_level_start_index=None,
            input_padding_mask=None, flow=None, *,
            n_heads, n_points, max_residue_magnitude=10.0):
    """stacked_feat: (N, 2*d_model, H, W); query/value: (N, d_model, H, W);
    reference_points: (N, H*W, 1, 2); input_spatial_shapes: (1, 2) = (H, W)."""
    del input_level_start_index
    N, C, H, W = value.shape
    d_model = C
    HW = H * W
    # NOTE: torch's host-sync assert sum(h*w) == H*W is skipped on purpose.

    # ---- que_proj / val_proj: NCHW consumed directly, bf16 channels-last out
    q_cl = conv1x1_cf2cl(query.reshape(N, C, HW),
                         params['que_proj_w'], params['que_proj_b'])
    v_cl = conv1x1_cf2cl(value.reshape(N, C, HW),
                         params['val_proj_w'], params['val_proj_b'])
    if input_padding_mask is not None:
        q_cl = jnp.where(input_padding_mask[..., None], 0, q_cl)
        v_cl = jnp.where(input_padding_mask[..., None], 0, v_cl)

    # ---- fused conv_offset stack on stacked_feat (one kernel, VMEM scratch)
    sf = jnp.transpose(stacked_feat, (0, 2, 3, 1))
    sf = jnp.pad(sf, ((0, 0), (1, 1), (1, 1), (0, 0))).astype(jnp.bfloat16)
    raw = n_heads * n_points * 2
    off = conv_offset_stack(sf, params, H=H, W=W,
                            mrm=max_residue_magnitude, out_raw=raw)  # (N,HW,Cpad)
    off = off[:, :, :raw]
    if flow is not None:
        flow_cl = jnp.transpose(flow, (0, 2, 3, 1)).reshape(N, HW, 2)
        off = off + jnp.tile(flow_cl, (1, 1, n_heads * n_points))
    off = off.reshape(N, HW, n_heads, n_points, 2)

    # ---- sampling locations, last dim = (x, y)
    offset_normalizer = jnp.stack(
        [input_spatial_shapes[..., 1], input_spatial_shapes[..., 0]], -1
    ).astype(jnp.float32)                                            # (1,2)=(W,H)
    sampling_locations = (reference_points[:, :, :, None, :] +
                          off / offset_normalizer[None, None, :, None, :])
    loc_x = sampling_locations[..., 0].reshape(N, HW, n_heads * n_points)
    loc_y = sampling_locations[..., 1].reshape(N, HW, n_heads * n_points)

    # ---- deformable attention core (all heads, lane-dense output)
    attn_out = deform_attn(v_cl, q_cl, loc_x, loc_y, H=H, W=W,
                           n_heads=n_heads, n_points=n_points)       # (N,HW,C)

    # ---- out_proj: channels-last in, NCHW out (no wrapper transpose)
    out = conv1x1_cl2cf(attn_out, params['out_proj_w'], params['out_proj_b'])
    return out.reshape(N, d_model, H, W)


# --------------------------------------------------------------------------- #
# deterministic init (last conv_offset layer zero-initialised like torch)
# --------------------------------------------------------------------------- #

def init_params(key, d_model, n_heads, n_points):
    ks = jax.random.split(key, 12)

    def lin_w(k, cin, cout):
        return jax.random.normal(k, (cin, cout), jnp.float32) / math.sqrt(cin)

    def conv_w(k, cin, cout):
        return (jax.random.normal(k, (3, 3, cin, cout), jnp.float32)
                / math.sqrt(9 * cin))

    def bias(k, cout):
        return 0.01 * jax.random.normal(k, (1, cout), jnp.float32)

    return {
        'que_proj_w': lin_w(ks[0], d_model, d_model), 'que_proj_b': bias(ks[1], d_model),
        'val_proj_w': lin_w(ks[2], d_model, d_model), 'val_proj_b': bias(ks[3], d_model),
        'out_proj_w': lin_w(ks[4], d_model, d_model), 'out_proj_b': bias(ks[5], d_model),
        'off_w0': conv_w(ks[6], 2 * d_model, d_model), 'off_b0': bias(ks[7], d_model),
        'off_w1': conv_w(ks[8], d_model, d_model), 'off_b1': bias(ks[9], d_model),
        'off_w2': conv_w(ks[10], d_model, d_model), 'off_b2': bias(ks[11], d_model),
        # torch init_offset(): last conv weight and bias are zero-initialised.
        'off_w3': jnp.zeros((3, 3, d_model, n_heads * n_points * 2), jnp.float32),
        'off_b3': jnp.zeros((1, n_heads * n_points * 2), jnp.float32),
    }


if __name__ == "__main__":
    d_model, n_heads, n_points = 32, 4, 4      # d_model // n_heads = 8 (power of 2)
    N, H, W = 2, 16, 16

    key = jax.random.PRNGKey(0)
    kp, ksf, kq, kv, kr = jax.random.split(key, 5)
    params = init_params(kp, d_model, n_heads, n_points)

    stacked_feat = jax.random.normal(ksf, (N, 2 * d_model, H, W), jnp.float32)  # NCHW
    query = jax.random.normal(kq, (N, d_model, H, W), jnp.float32)              # NCHW
    value = jax.random.normal(kv, (N, d_model, H, W), jnp.float32)              # NCHW
    reference_points = jax.random.uniform(kr, (N, H * W, 1, 2), jnp.float32)
    input_spatial_shapes = jnp.array([[H, W]], dtype=jnp.int32)
    input_level_start_index = jnp.array([0], dtype=jnp.int32)

    out = forward(params, stacked_feat, reference_points, query, value,
                  input_spatial_shapes, input_level_start_index,
                  n_heads=n_heads, n_points=n_points, max_residue_magnitude=10.0)
    out = jax.block_until_ready(out)
    assert out.shape == (N, d_model, H, W)
    assert bool(jnp.all(jnp.isfinite(out)))
    print("KERNEL_OK")
</pallas_src>

<mosaic_0001>
module attributes {stable_mosaic.version = 11 : i64} {
  func.func @_proj_cf2cl_kernel(%arg0: i32, %arg1: i32, %arg2: memref<1x32x256xf32, #tpu.memory_space<vmem>>, %arg3: memref<32x32xbf16, #tpu.memory_space<vmem>>, %arg4: memref<1x32xf32, #tpu.memory_space<vmem>>, %arg5: memref<1x256x32xbf16, #tpu.memory_space<vmem>>) attributes {dimension_semantics = [#tpu.dimension_semantics<parallel>, #tpu.dimension_semantics<parallel>], iteration_bounds = array<i64: 2, 1>, scalar_prefetch = 0 : i64, scratch_operands = 0 : i64, tpu.core_type = #tpu.core_type<tc>, window_params = [{transform_indices = @transform_0, window_bounds = array<i64: 1, 32, 256>}, {pipeline_mode = #tpu.pipeline_mode<synchronous>, transform_indices = @transform_1, window_bounds = array<i64: 32, 32>}, {pipeline_mode = #tpu.pipeline_mode<synchronous>, transform_indices = @transform_2, window_bounds = array<i64: 1, 32>}, {transform_indices = @transform_3, window_bounds = array<i64: 1, 256, 32>}]} {
    %c0 = arith.constant 0 : index
    %c0_0 = arith.constant 0 : index
    %c0_1 = arith.constant 0 : index
    %0 = vector.load %arg2[%c0, %c0_0, %c0_1] : memref<1x32x256xf32, #tpu.memory_space<vmem>>, vector<1x32x256xf32>
    %1 = vector.shape_cast %0 : vector<1x32x256xf32> to vector<32x256xf32>
    %2 = arith.truncf %1 : vector<32x256xf32> to vector<32x256xbf16>
    %c0_2 = arith.constant 0 : index
    %c0_3 = arith.constant 0 : index
    %3 = vector.load %arg3[%c0_2, %c0_3] : memref<32x32xbf16, #tpu.memory_space<vmem>>, vector<32x32xbf16>
    %cst = arith.constant dense<0.000000e+00> : vector<256x32xf32>
    %4 = tpu.matmul %2, %3, %cst {dimension_numbers = #tpu.dot_dimension_numbers<[0], [0], [1], [1], [0, 1, 1, 1], [], []>} : vector<32x256xbf16>, vector<32x32xbf16>, vector<256x32xf32> -> vector<256x32xf32>
    %c0_4 = arith.constant 0 : index
    %c0_5 = arith.constant 0 : index
    %5 = vector.load %arg4[%c0_4, %c0_5] : memref<1x32xf32, #tpu.memory_space<vmem>>, vector<1x32xf32>
    %6 = vector.broadcast %5 : vector<1x32xf32> to vector<256x32xf32>
    %7 = arith.addf %4, %6 : vector<256x32xf32>
    %8 = arith.truncf %7 : vector<256x32xf32> to vector<256x32xbf16>
    %c0_6 = arith.constant 0 : index
    %c0_7 = arith.constant 0 : index
    %c0_8 = arith.constant 0 : index
    %9 = vector.load %arg5[%c0_6, %c0_7, %c0_8] : memref<1x256x32xbf16, #tpu.memory_space<vmem>>, vector<1x256x32xbf16>
    %10 = vector.shape_cast %9 : vector<1x256x32xbf16> to vector<256x32xbf16>
    %11 = vector.shape_cast %8 : vector<256x32xbf16> to vector<1x256x32xbf16>
    tpu.vector_store %arg5[%c0_6, %c0_7, %c0_8], %11 {strides = array<i32>} : memref<1x256x32xbf16, #tpu.memory_space<vmem>>, vector<1x256x32xbf16>,
    return
  }
  func.func @transform_0(%arg0: i32, %arg1: i32) -> (i32, i32, i32) {
    %c0_i32 = arith.constant 0 : i32
    %c0_i32_0 = arith.constant 0 : i32
    return %arg0, %c0_i32, %arg1 : i32, i32, i32
  }
  func.func @transform_1(%arg0: i32, %arg1: i32) -> (i32, i32) {
    %c0_i32 = arith.constant 0 : i32
    %c0_i32_0 = arith.constant 0 : i32
    %c0_i32_1 = arith.constant 0 : i32
    return %c0_i32, %c0_i32_0 : i32, i32
  }
  func.func @transform_2(%arg0: i32, %arg1: i32) -> (i32, i32) {
    %c0_i32 = arith.constant 0 : i32
    %c0_i32_0 = arith.constant 0 : i32
    %c0_i32_1 = arith.constant 0 : i32
    return %c0_i32, %c0_i32_0 : i32, i32
  }
  func.func @transform_3(%arg0: i32, %arg1: i32) -> (i32, i32, i32) {
    %c0_i32 = arith.constant 0 : i32
    %c0_i32_0 = arith.constant 0 : i32
    return %arg0, %arg1, %c0_i32 : i32, i32, i32
  }
}

</mosaic_0001>

<bundles_post_ra>
// kernel: tpu_custom_call.1
= control target key start
LH: loop header
LB: loop body
LE: loop exit
PB: predicated region body
PF: predicated region fallthrough
CT: control target
= control target key end

     0   :  { %8 = vsyncpa [#allocation3], 0  ;;  %s1426_s0 = inlined_call_operand.hbm [shape: f32[2,32,256], index: 0, kind: input, shape index: {}]   ;;  %s1427_s1 = inlined_call_operand.hbm [shape: bf16[32,32], index: 1, kind: input, shape index: {}]   ;;  %s1428_s2 = inlined_call_operand.vmem [shape: f32[1,32], index: 2, kind: input, shape index: {}]   ;;  %s1429_s3 = inlined_call_operand.vmem [shape: bf16[2,256,32], index: 3, kind: output, shape index: {}]  }
   0x1   :  { %10 = vsyncpa [#allocation3 + $0x1], 0 }
   0x2   :  { %11 = vsyncpa [#allocation5], 0  ;;  %s1149_s12 = smov 0   ;;  %s1151_s13 = smov 0  }
   0x3   :  { %s1153_s14 = smov 0   ;;  %s1155_s15 = smov 0  }
   0x4   :  { %s1157_s16 = smov 0   ;;  %s1159_s17 = smov 0  }
   0x5 LB: > { %s778_s18 = sadd.s32 4294967295, %s1121_s17   ;;  %p51_p0 = scmp.ne.s32.totalorder %s1105_s13, %s1101_s12  ;;  %s1121_s17 = sphi %s1159_s17, %s17_s17   ;;  %s1117_s16 = sphi %s1157_s16, %s1446_s16   ;;  %s1113_s15 = sphi %s1155_s15, %s1445_s15   ;;  %s1109_s14 = sphi %s1153_s14, %s1444_s14   ;;  %s1105_s13 = sphi %s1151_s13, %s1443_s13   ;;  %s1101_s12 = sphi %s1149_s12, %s1442_s12  }
   0x6   : > { %p1179_p1 = scmp.eq.s32.totalorder %s778_s18, 0  ;;  %p780_p2 = scmp.ge.s32.totalorder %s1121_s17, 1 }
   0x7   : > { %p132_p3 = scmp.lt.s32.totalorder %s1121_s17, 3  ;;  %s1123_s22 = smov [#allocation4]  }
   0x8   : > { %s1434_s19 = scalar_select %p1179_p1, 1, 0 }
   0x9   : > { %p1187_p4 = por %p1179_p1, %p51_p0  ;;  %p1191_p5 = pnand %p780_p2, %p132_p3 }
   0xa   : > { %s144_s23 = sshll.u32 %s1123_s22, 4  ;;  %s29_s25 = sadd.s32 1, %s1117_s16  ;;  %s145_s23 = int_to_ptr.vmem [resolvable:$true] %s144_s23 }
   0xb   : > { %s1435_s20 = scalar_select %p1187_p4, 1, 0 }
   0xc   : > { %s1436_s21 = scalar_select %p1191_p5, 1, 0 }
   0xd   : > { %p942_p6 = pneg %p1191_p5  ;;  %s1009_s28 = scalar_lea.hbm %s1427_s1, 256 }
   0xe   : > { %p1010_p8 = scmp.ne.s32.totalorder %s1427_s1, %s1009_s28  ;;  %p1016_p12 = scmp.lt.u32.totalorder %s1009_s28, %s1427_s1 }
   0xf   : > { %p1199_p7 = pnand %p942_p6, %p1179_p1 }
  0x11   : > { %p1011_p9 = pneg %p1199_p7 }
  0x13   : > { %p1012_p10 = pnand %p1011_p9, %p1010_p8 }
  0x15   : > { %p1013_p11 = pneg %p1012_p10 }
  0x17   : > { %p1018_p13 = pnand %p1016_p12, %p1013_p11 }
  0x19   : > { %1021 = shalt.err (!%p1018_p13)
}
  0x1a   : > { %s1022_s6 = scalar_lea.vmem %s145_s23, 256  ;;  %p1030_p6 = scmp.lt.s32.totalorder %s145_s23, %s145_s23 }
  0x1b   : > { %p1023_p0 = scmp.ne.s32.totalorder %s145_s23, %s1022_s6  ;;  %p1031_p1 = scmp.lt.s32.totalorder %s1022_s6, %s1022_s6 }
  0x1d   : > { %p1025_p2 = pnand %p1023_p0, %p1011_p9  ;;  %p1032_p4 = por %p1031_p1, %p1030_p6 }
  0x1f   : > { %p1026_p3 = pneg %p1025_p2 }
  0x21   : > { %p1033_p5 = pnand %p1032_p4, %p1026_p3 }
  0x23   : > { %1036 = shalt.err (!%p1033_p5)
}
  0x24   : > { %s1124_s7 = smov 64   ;;  %s1125_s8 = smov 4  }
  0x25   : > { %945 = dma.hbm_to_vmem [thread:$0]  (!%p1199_p7), %s1427_s1, 256, %s145_s23, [#allocation5], %s1124_s7, %s1124_s7, %s1125_s8  }
  0x26   : > { %p31_p1 = scmp.ge.s32.totalorder %s29_s25, 2  ;;  %s38_s11 = sadd.s32 1, %s1109_s14 }
  0x27   : > { %p45_p4 = scmp.ne.s32.totalorder %s1109_s14, %s1105_s13  ;;  %p46_p5 = scmp.eq.s32.totalorder %s1121_s17, 0 }
  0x28   : > { %s1448_s25 = smov (%p31_p1, %s29_s25), 0  ;;  %p951_p9 = scmp.lt.s32.totalorder %s1121_s17, 2 }
  0x29   : > { %p47_p8 = por %p46_p5, %p45_p4  ;;  %s33_s12 = ssub.s32 %s1117_s16, %s1448_s25 }
  0x2a   : > { %s161_s18 = sand.u32 1, %s1109_s14   ;;  %p36_p10 = scmp.eq.s32.totalorder %s33_s12, 0 }
  0x2b   : > { %s783_s22 = sshll.u32 %s161_s18, 6  ;;  %s844_s26 = sshll.u32 %s1117_s16, 10 }
  0x2c   : > { %s1232_s27 = scalar_select %p36_p10, %s1109_s14, %s38_s11  }
  0x2d   : > { %s1237_s23 = scalar_lea.hbm %s1426_s0, %s844_s26  ;;  %s165_s29 = scalar_lea.vmem [#allocation2], %s783_s22 }
  0x2e   : > { %s174_s30 = sshll.u32 %s165_s29, 4  ;;  %p1239_p7 = pnand %p951_p9, %p47_p8  ;;  %s1243_s30 = int_to_ptr.vmem [resolvable:$true] %s174_s30 }
  0x2f   : > { %s1245_s5 = scalar_lea.sflag [#allocation3], %s161_s18  ;;  %s1037_s6 = scalar_lea.hbm %s1237_s23, 1024 }
  0x30   : > { %p1038_p11 = scmp.ne.s32.totalorder %s1237_s23, %s1037_s6  ;;  %p1039_p12 = pneg %p1239_p7 }
  0x31   : > { %s1042_s9 = scalar_lea.hbm %s1426_s0, 2048  ;;  %p1043_p2 = scmp.lt.u32.totalorder %s1237_s23, %s1426_s0 }
  0x32   : > { %p1040_p13 = pnand %p1039_p12, %p1038_p11  ;;  %p1044_p3 = scmp.lt.u32.totalorder %s1042_s9, %s1037_s6 }
  0x33   : > { %p1046_p1 = scmp.lt.u32.totalorder %s1037_s6, %s1237_s23 }
  0x34   : > { %p1041_p0 = pneg %p1040_p13  ;;  %p1045_p6 = por %p1044_p3, %p1043_p2 }
  0x36   : > { %p1047_p4 = por %p1046_p1, %p1045_p6 }
  0x38   : > { %p1048_p5 = pnand %p1047_p4, %p1041_p0 }
  0x3a   : > { %1051 = shalt.err (!%p1048_p5)
}
  0x3b   : > { %s1052_s12 = scalar_lea.vmem %s1243_s30, 1024  ;;  %s1126_s18 = smov [#allocation2]  }
  0x3c   : > { %p1053_p8 = scmp.ne.s32.totalorder %s1243_s30, %s1052_s12  ;;  %s1057_s22 = sshll.u32 %s1126_s18, 4  ;;  %s1058_s22 = int_to_ptr.vmem [resolvable:$false] %s1057_s22 }
  0x3d   : > { %s1059_s26 = scalar_lea.vmem %s1058_s22, 2048  ;;  %p1060_p11 = scmp.lt.s32.totalorder %s1243_s30, %s1058_s22 }
  0x3e   : > { %p1055_p9 = pnand %p1053_p8, %p1039_p12  ;;  %p1061_p13 = scmp.lt.s32.totalorder %s1059_s26, %s1052_s12 }
  0x40   : > { %p1056_p10 = pneg %p1055_p9  ;;  %p1062_p2 = por %p1061_p13, %p1060_p11 }
  0x42   : > { %p1063_p3 = pnand %p1062_p2, %p1056_p10 }
  0x44   : > { %1066 = shalt.err (!%p1063_p3)
}
  0x45   : > { %s1127_s24 = smov 256   ;;  %s1128_s28 = smov 16  }
  0x46   : > { %949 = dma.hbm_to_vmem [thread:$0]  (!%p1239_p7), %s1237_s23, 1024, %s1243_s30, %s1245_s5, %s1127_s24, %s1127_s24, %s1128_s28  }
  0x47   : > { %p1439_p12 = scmp.ne.s32.totalorder %s1436_s21, 0 }
  0x48   : > { %s188_s29 = sand.u32 (!%p1439_p12), 1, %s1105_s13   ;;  %p1440_p0 = scmp.ne.s32.totalorder (!%p1439_p12), %s1435_s20, 0 }
  0x49   : > { %186 = sbr.rel (%p1439_p12) target bundleno = 439 (0x1b7), region = 32  ;;  %s787_s6 = sshll.u32 (!%p1439_p12), %s188_s29, 6 }
  0x4a   : > { %s189_s7 = scalar_lea.sflag (!%p1439_p12), [#allocation3], %s188_s29  ;;  %s192_s8 = scalar_lea.vmem (!%p1439_p12), [#allocation2], %s787_s6 }
  0x50   : > { %1092 = dma.done.wait (%p1440_p0), %s189_s7, 1024  }
  0x51   : > { %1094 = vsyncadd (%p1440_p0), %s189_s7, 4294966272  ;;  %p1441_p6 = scmp.ne.s32.totalorder %s1434_s19, 0 }
  0x53   : > { %1096 = dma.done.wait (%p1441_p6), [#allocation5], 256  }
  0x54   : > { %1098 = vsyncadd (%p1441_p6), [#allocation5], 4294967040  ;;  %v236_v0 = vld [vmem:[%s192_s8 + $0x8] sm:$0xff]  ;;  %v238_v1 = vld [vmem:[%s192_s8 + $0x18] sm:$0xff]  ;;  %vm302_vm0 = vcmask 261120   ;;  %p225_p7 = scmp.lt.s32.totalorder %s1113_s15, 1 }
  0x55   : > { %v235_v2 = vld [vmem:[%s192_s8] sm:$0xff]  ;;  %v244_v3 = vpack.c.bf16 %v238_v1, %v236_v0  ;;  %v237_v4 = vld [vmem:[%s192_s8 + $0x10] sm:$0xff]  ;;  %v240_v5 = vld [vmem:[%s192_s8 + $0x28] sm:$0xff]  ;;  %vm640_vm1 = vcmask 257024  }
  0x56   : > { %v242_v6 = vld [vmem:[%s192_s8 + $0x38] sm:$0xff]  ;;  %v243_v7 = vpack.c.bf16 %v237_v4, %v235_v2  ;;  %v239_v8 = vld [vmem:[%s192_s8 + $0x20] sm:$0xff]  ;;  %v241_v9 = vld [vmem:[%s192_s8 + $0x30] sm:$0xff]  ;;  %s1450_s15 = smov (!%p225_p7, %s1113_s15), 1 }
  0x57   : > { %274 = vxpose.xlu1.c.b16.start [1/2] (short) %v244_v3, 128  ;;  %v246_v10 = vpack.c.bf16 %v242_v6, %v240_v5  ;;  %v1007_v11 = vld [vmem:[#allocation4] sm:$0xff]   ;;  %v245_v12 = vpack.c.bf16 %v241_v9, %v239_v8  ;;  %v1008_v13 = vld [vmem:[#allocation4 + $0x8] sm:$0xff]   ;;  %s845_s21 = sshll.u32 %s1450_s15, 7 }
  0x58   : > { %258 = vxpose.xlu0.c.b16.start [1/2] (short) %v243_v7, 128  ;;  %896 = vmatprep.subr.bf16.mxu0 %v1007_v11  ;;  %v1305_v30 = vld [vmem:[%s1428_s2] ss:$0 sm:$0xff]  ;;  %s1311_s4 = scalar_lea.vmem %s1429_s3, %s845_s21 }
  0x59   : > { %932 = vmatprep.subr.bf16.mxu1 %v1007_v11  ;;  %897 = vmatpush3.bf16.msra.mxu0 %v1007_v11 }
  0x5a   : > { %934 = vmatpush3.bf16.msra.mxu1 %v1007_v11  ;;  %898 = vmatprep.subr.bf16.mxu0 %v1008_v13 }
  0x5b   : > { %275 = vxpose.xlu1.c.b16.end [2/2] (short) %v246_v10, 128  ;;  %933 = vmatprep.subr.bf16.mxu1 %v1008_v13 }
  0x5c   : > { %259 = vxpose.xlu0.c.b16.end [2/2] (short) %v245_v12, 128 }
  0x5d   : > { %899 = vmatpush3.bf16.msra.mxu0 %v1008_v13 }
  0x5e   : > { %935 = vmatpush3.bf16.msra.mxu1 %v1008_v13 }
  0xbd   : > { %v282_v14 = vpop.trf.xlu1 }
  0xbe   : > { %v266_v15 = vpop.trf.xlu0  ;;  %916 = vmatprep.mubr.msk.bf16.mxu1 %vm302_vm0, %v282_v14 }
  0xbf   : > { %900 = vmatprep.mubr.msk.bf16.mxu0 %vm302_vm0, %v266_v15 }
  0xc1   : > { %v283_v16 = vpop.trf.xlu1 }
  0xc2   : > { %v267_v17 = vpop.trf.xlu0  ;;  %917 = vmatmul.mubr.msk.bf16.vlgmr.msra.gmra.mrb[0].mxu1 %vm302_vm0, %v283_v16 }
  0xc3   : > { %901 = vmatmul.mubr.msk.bf16.vlgmr.msra.gmra.mrb[0].mxu0 %vm302_vm0, %v267_v17 }
  0xc5   : > { %v284_v18 = vpop.trf.xlu1 }
  0xc6   : > { %v268_v19 = vpop.trf.xlu0  ;;  %920 = vmatprep.mubr.msk.bf16.mxu1 %vm302_vm0, %v284_v18 }
  0xc7   : > { %904 = vmatprep.mubr.msk.bf16.mxu0 %vm302_vm0, %v268_v19 }
  0xc9   : > { %v285_v20 = vpop.trf.xlu1 }
  0xca   : > { %v269_v21 = vpop.trf.xlu0  ;;  %921 = vmatmul.mubr.msk.bf16.gmra.mrb[4].mxu1 %vm302_vm0, %v285_v20 }
  0xcb   : > { %905 = vmatmul.mubr.msk.bf16.gmra.mrb[4].mxu0 %vm302_vm0, %v269_v21 }
  0xcd   : > { %v286_v22 = vpop.trf.xlu1 }
  0xce   : > { %v270_v23 = vpop.trf.xlu0  ;;  %924 = vmatprep.mubr.msk.bf16.mxu1 %vm302_vm0, %v286_v22 }
  0xcf   : > { %908 = vmatprep.mubr.msk.bf16.mxu0 %vm302_vm0, %v270_v23 }
  0xd1   : > { %v287_v24 = vpop.trf.xlu1 }
  0xd2   : > { %v271_v25 = vpop.trf.xlu0  ;;  %925 = vmatmul.mubr.msk.bf16.gmra.mrb[8].mxu1 %vm302_vm0, %v287_v24 }
  0xd3   : > { %909 = vmatmul.mubr.msk.bf16.gmra.mrb[8].mxu0 %vm302_vm0, %v271_v25 }
  0xd5   : > { %v288_v26 = vpop.trf.xlu1 }
  0xd6   : > { %v272_v27 = vpop.trf.xlu0  ;;  %928 = vmatprep.mubr.msk.bf16.mxu1 %vm302_vm0, %v288_v26 }
  0xd7   : > { %912 = vmatprep.mubr.msk.bf16.mxu0 %vm302_vm0, %v272_v27 }
  0xd9   : > { %v289_v28 = vpop.trf.xlu1 }
  0xda   : > { %v273_v29 = vpop.trf.xlu0  ;;  %929 = vmatmul.mubr.msk.bf16.gmra.mrb[12].mxu1 %vm302_vm0, %v289_v28 }
  0xdb   : > { %913 = vmatmul.mubr.msk.bf16.gmra.mrb[12].mxu0 %vm302_vm0, %v273_v29 }
 0x195   : > { %v918_v31 = vpop.f32.mrb[0].mxu1 }
 0x196   : > { %v902_v32 = vpop.f32.mrb[0].mxu0  ;;  %v458_v33 = vadd.f32 %v918_v31, %v1305_v30  ;;  %v449_v34 = vpop.f32.mrb[1].mxu1 }
 0x197   : > { %v394_v35 = vadd.f32 %v902_v32, %v1305_v30  ;;  %v385_v36 = vpop.f32.mrb[1].mxu0  ;;  %v450_v37 = vadd.f32 %v1305_v30, %v449_v34  ;;  %v919_v38 = vpop.f32.mrb[2].mxu1 }
 0x198   : > { %v864_v39 = vpack.c.bf16 %v458_v33, %v458_v33  ;;  %v386_v40 = vadd.f32 %v1305_v30, %v385_v36  ;;  %v903_v41 = vpop.f32.mrb[2].mxu0  ;;  %v461_v42 = vadd.f32 %v919_v38, %v1305_v30  ;;  %v452_v43 = vpop.f32.mrb[3].mxu1 }
 0x199   : > { %v848_v44 = vpack.c.bf16 %v394_v35, %v394_v35  ;;  %v862_v45 = vpack.c.bf16 %v450_v37, %v450_v37  ;;  %v397_v46 = vadd.f32 %v903_v41, %v1305_v30  ;;  %v388_v47 = vpop.f32.mrb[3].mxu0  ;;  %v453_v48 = vadd.f32 %v1305_v30, %v452_v43 }
 0x19a   : > { %659 = vst.msk [vmem:[%s1311_s4 + $0x48] sm:$0xf] %vm640_vm1, %v864_v39  ;;  %v846_v49 = vpack.c.bf16 %v386_v40, %v386_v40  ;;  %v865_v50 = vpack.c.bf16 %v461_v42, %v461_v42  ;;  %v389_v51 = vadd.f32 %v1305_v30, %v388_v47 }
 0x19b   : > { %643 = vst.msk [vmem:[%s1311_s4 + $0x8] sm:$0xf] %vm640_vm1, %v848_v44  ;;  %657 = vst.msk [vmem:[%s1311_s4 + $0x40] sm:$0xf] %vm640_vm1, %v862_v45  ;;  %v849_v52 = vpack.c.bf16 %v397_v46, %v397_v46  ;;  %v863_v53 = vpack.c.bf16 %v453_v48, %v453_v48 }
 0x19c   : > { %641 = vst.msk [vmem:[%s1311_s4] sm:$0xf] %vm640_vm1, %v846_v49  ;;  %660 = vst.msk [vmem:[%s1311_s4 + $0x4c] sm:$0xf] %vm640_vm1, %v865_v50  ;;  %v847_v54 = vpack.c.bf16 %v389_v51, %v389_v51 }
 0x19d   : > { %644 = vst.msk [vmem:[%s1311_s4 + $0xc] sm:$0xf] %vm640_vm1, %v849_v52  ;;  %658 = vst.msk [vmem:[%s1311_s4 + $0x44] sm:$0xf] %vm640_vm1, %v863_v53  ;;  %v922_v55 = vpop.f32.mrb[4].mxu1 }
 0x19e   : > { %642 = vst.msk [vmem:[%s1311_s4 + $0x4] sm:$0xf] %vm640_vm1, %v847_v54  ;;  %v906_v56 = vpop.f32.mrb[4].mxu0  ;;  %v474_v57 = vadd.f32 %v922_v55, %v1305_v30  ;;  %v465_v58 = vpop.f32.mrb[5].mxu1 }
 0x19f   : > { %v410_v59 = vadd.f32 %v906_v56, %v1305_v30  ;;  %v401_v60 = vpop.f32.mrb[5].mxu0  ;;  %v466_v61 = vadd.f32 %v1305_v30, %v465_v58  ;;  %v923_v62 = vpop.f32.mrb[6].mxu1 }
 0x1a0   : > { %v868_v63 = vpack.c.bf16 %v474_v57, %v474_v57  ;;  %v402_v0 = vadd.f32 %v1305_v30, %v401_v60  ;;  %v907_v1 = vpop.f32.mrb[6].mxu0  ;;  %v477_v2 = vadd.f32 %v923_v62, %v1305_v30  ;;  %v468_v3 = vpop.f32.mrb[7].mxu1 }
 0x1a1   : > { %v852_v4 = vpack.c.bf16 %v410_v59, %v410_v59  ;;  %v866_v5 = vpack.c.bf16 %v466_v61, %v466_v61  ;;  %v413_v6 = vadd.f32 %v907_v1, %v1305_v30  ;;  %v404_v7 = vpop.f32.mrb[7].mxu0  ;;  %v469_v8 = vadd.f32 %v1305_v30, %v468_v3 }
 0x1a2   : > { %663 = vst.msk [vmem:[%s1311_s4 + $0x58] sm:$0xf] %vm640_vm1, %v868_v63  ;;  %v850_v9 = vpack.c.bf16 %v402_v0, %v402_v0  ;;  %v869_v10 = vpack.c.bf16 %v477_v2, %v477_v2  ;;  %v405_v11 = vadd.f32 %v1305_v30, %v404_v7 }
 0x1a3   : > { %647 = vst.msk [vmem:[%s1311_s4 + $0x18] sm:$0xf] %vm640_vm1, %v852_v4  ;;  %661 = vst.msk [vmem:[%s1311_s4 + $0x50] sm:$0xf] %vm640_vm1, %v866_v5  ;;  %v853_v12 = vpack.c.bf16 %v413_v6, %v413_v6  ;;  %v867_v13 = vpack.c.bf16 %v469_v8, %v469_v8 }
 0x1a4   : > { %645 = vst.msk [vmem:[%s1311_s4 + $0x10] sm:$0xf] %vm640_vm1, %v850_v9  ;;  %664 = vst.msk [vmem:[%s1311_s4 + $0x5c] sm:$0xf] %vm640_vm1, %v869_v10  ;;  %v851_v14 = vpack.c.bf16 %v405_v11, %v405_v11 }
 0x1a5   : > { %648 = vst.msk [vmem:[%s1311_s4 + $0x1c] sm:$0xf] %vm640_vm1, %v853_v12  ;;  %662 = vst.msk [vmem:[%s1311_s4 + $0x54] sm:$0xf] %vm640_vm1, %v867_v13  ;;  %v926_v15 = vpop.f32.mrb[8].mxu1 }
 0x1a6   : > { %646 = vst.msk [vmem:[%s1311_s4 + $0x14] sm:$0xf] %vm640_vm1, %v851_v14  ;;  %v910_v16 = vpop.f32.mrb[8].mxu0  ;;  %v490_v17 = vadd.f32 %v926_v15, %v1305_v30  ;;  %v481_v18 = vpop.f32.mrb[9].mxu1 }
 0x1a7   : > { %v426_v19 = vadd.f32 %v910_v16, %v1305_v30  ;;  %v417_v20 = vpop.f32.mrb[9].mxu0  ;;  %v482_v21 = vadd.f32 %v1305_v30, %v481_v18  ;;  %v927_v22 = vpop.f32.mrb[10].mxu1 }
 0x1a8   : > { %v872_v23 = vpack.c.bf16 %v490_v17, %v490_v17  ;;  %v418_v24 = vadd.f32 %v1305_v30, %v417_v20  ;;  %v911_v25 = vpop.f32.mrb[10].mxu0  ;;  %v493_v26 = vadd.f32 %v927_v22, %v1305_v30  ;;  %v484_v27 = vpop.f32.mrb[11].mxu1 }
 0x1a9   : > { %v856_v28 = vpack.c.bf16 %v426_v19, %v426_v19  ;;  %v870_v29 = vpack.c.bf16 %v482_v21, %v482_v21  ;;  %v429_v31 = vadd.f32 %v911_v25, %v1305_v30  ;;  %v420_v32 = vpop.f32.mrb[11].mxu0  ;;  %v485_v33 = vadd.f32 %v1305_v30, %v484_v27 }
 0x1aa   : > { %667 = vst.msk [vmem:[%s1311_s4 + $0x68] sm:$0xf] %vm640_vm1, %v872_v23  ;;  %v854_v34 = vpack.c.bf16 %v418_v24, %v418_v24  ;;  %v873_v35 = vpack.c.bf16 %v493_v26, %v493_v26  ;;  %v421_v36 = vadd.f32 %v1305_v30, %v420_v32 }
 0x1ab   : > { %651 = vst.msk [vmem:[%s1311_s4 + $0x28] sm:$0xf] %vm640_vm1, %v856_v28  ;;  %665 = vst.msk [vmem:[%s1311_s4 + $0x60] sm:$0xf] %vm640_vm1, %v870_v29  ;;  %v857_v37 = vpack.c.bf16 %v429_v31, %v429_v31  ;;  %v871_v38 = vpack.c.bf16 %v485_v33, %v485_v33 }
 0x1ac   : > { %649 = vst.msk [vmem:[%s1311_s4 + $0x20] sm:$0xf] %vm640_vm1, %v854_v34  ;;  %668 = vst.msk [vmem:[%s1311_s4 + $0x6c] sm:$0xf] %vm640_vm1, %v873_v35  ;;  %v855_v39 = vpack.c.bf16 %v421_v36, %v421_v36 }
 0x1ad   : > { %652 = vst.msk [vmem:[%s1311_s4 + $0x2c] sm:$0xf] %vm640_vm1, %v857_v37  ;;  %666 = vst.msk [vmem:[%s1311_s4 + $0x64] sm:$0xf] %vm640_vm1, %v871_v38  ;;  %v930_v40 = vpop.f32.mrb[12].mxu1 }
 0x1ae   : > { %650 = vst.msk [vmem:[%s1311_s4 + $0x24] sm:$0xf] %vm640_vm1, %v855_v39  ;;  %v914_v41 = vpop.f32.mrb[12].mxu0  ;;  %v506_v42 = vadd.f32 %v930_v40, %v1305_v30  ;;  %v497_v43 = vpop.f32.mrb[13].mxu1 }
 0x1af   : > { %v442_v44 = vadd.f32 %v914_v41, %v1305_v30  ;;  %v433_v45 = vpop.f32.mrb[13].mxu0  ;;  %v498_v46 = vadd.f32 %v1305_v30, %v497_v43  ;;  %v931_v47 = vpop.f32.mrb[14].mxu1 }
 0x1b0   : > { %v876_v48 = vpack.c.bf16 %v506_v42, %v506_v42  ;;  %v434_v49 = vadd.f32 %v1305_v30, %v433_v45  ;;  %v915_v50 = vpop.f32.mrb[14].mxu0  ;;  %v509_v51 = vadd.f32 %v931_v47, %v1305_v30  ;;  %v500_v52 = vpop.f32.mrb[15].mxu1 }
 0x1b1   : > { %v860_v53 = vpack.c.bf16 %v442_v44, %v442_v44  ;;  %v874_v54 = vpack.c.bf16 %v498_v46, %v498_v46  ;;  %v445_v55 = vadd.f32 %v915_v50, %v1305_v30  ;;  %v436_v56 = vpop.f32.mrb[15].mxu0  ;;  %v501_v57 = vadd.f32 %v1305_v30, %v500_v52 }
 0x1b2   : > { %671 = vst.msk [vmem:[%s1311_s4 + $0x78] sm:$0xf] %vm640_vm1, %v876_v48  ;;  %v858_v58 = vpack.c.bf16 %v434_v49, %v434_v49  ;;  %v877_v59 = vpack.c.bf16 %v509_v51, %v509_v51  ;;  %v437_v60 = vadd.f32 %v1305_v30, %v436_v56 }
 0x1b3   : > { %655 = vst.msk [vmem:[%s1311_s4 + $0x38] sm:$0xf] %vm640_vm1, %v860_v53  ;;  %669 = vst.msk [vmem:[%s1311_s4 + $0x70] sm:$0xf] %vm640_vm1, %v874_v54  ;;  %v861_v61 = vpack.c.bf16 %v445_v55, %v445_v55  ;;  %v875_v62 = vpack.c.bf16 %v501_v57, %v501_v57 }
 0x1b4   : > { %653 = vst.msk [vmem:[%s1311_s4 + $0x30] sm:$0xf] %vm640_vm1, %v858_v58  ;;  %672 = vst.msk [vmem:[%s1311_s4 + $0x7c] sm:$0xf] %vm640_vm1, %v877_v59  ;;  %v859_v63 = vpack.c.bf16 %v437_v60, %v437_v60 }
 0x1b5   : > { %656 = vst.msk [vmem:[%s1311_s4 + $0x3c] sm:$0xf] %vm640_vm1, %v861_v61  ;;  %670 = vst.msk [vmem:[%s1311_s4 + $0x74] sm:$0xf] %vm640_vm1, %v875_v62 }
 0x1b6   : > { %654 = vst.msk [vmem:[%s1311_s4 + $0x34] sm:$0xf] %vm640_vm1, %v859_v63 }
 0x1b7 PF: > { %s17_s17 = sadd.s32 1, %s1121_s17   ;;  %s1442_s12 = smov %s1105_s13 }
 0x1b8   : > { %p14_p1 = scmp.ge.s32.totalorder %s17_s17, 4   ;;  %s1443_s13 = smov %s1109_s14 }
 0x1b9   : > { %s1444_s14 = smov %s1232_s27  ;;  %s1445_s15 = smov %s1117_s16 }
 0x1ba   : > { %s1446_s16 = smov %s1448_s25  ;;  %16 = sbr.rel (!%p14_p1) target bundleno = 5 (0x5), region = 76 }
 0x1c1   :  { %703 = vsyncpa [#allocation3], 1 }
 0x1c2   :  { %705 = vsyncpa [#allocation3 + $0x1], 1 }
 0x1c3   :  { %706 = vsyncpa [#allocation5], 1 }

</bundles_post_ra>
